<compile_context>
chip_gen: v7x
topology: tpu7x:2x2x1
jax: 0.10.0
libtpu: 0.0.40
codegen_flags: <defaults>
</compile_context>

<pallas_src>
import jax
import jax.numpy as jnp
from jax.experimental import pallas as pl
from jax.experimental.pallas import tpu as pltpu


def _round_up(x, m):
    return (x + m - 1) // m * m


def _is_v7x():
    try:
        return "v7" in jax.devices()[0].device_kind.lower()
    except Exception:
        return False


def _pick_batch_tile(batch, block_b, min_steps):
    """Batch tile: multiple of 8 sublanes (or == batch), boundary block masked."""
    cap = max(8, _round_up(block_b, 8))
    if batch <= cap:
        tb = batch                      # single block; block == full dim is legal
    else:
        tb = cap                        # multiple of 8; ragged tail masked by Pallas
    # Keep >= min_steps grid steps when the batch is big enough (v7x: 2 TCs on the
    # "parallel" axis -> want >= 2 steps per core so each core still overlaps DMA).
    if min_steps > 1 and batch >= min_steps * 8:
        tb = min(tb, _round_up(pl.cdiv(batch, min_steps), 8))
    return tb


def decoder_kernel(x_ref, w1_ref, b1_ref, w2_ref, b2_ref, o_ref):
    # Hidden layer: h = tanh(x @ W1 + b1). bf16 MXU operands, f32 accumulate,
    # f32 bias-add + tanh (VPU/EUP path stays f32 -> correct & cheap on v5e too).
    x = x_ref[...]
    if x.dtype != jnp.bfloat16:          # no cast when x is streamed as bf16
        x = x.astype(jnp.bfloat16)
    h = jnp.tanh(
        jnp.dot(x, w1_ref[...], preferred_element_type=jnp.float32) + b1_ref[...]
    )
    # Output layer: y = h @ W2 + b2 (h cast to bf16 only at the dot boundary).
    y = (
        jnp.dot(h.astype(jnp.bfloat16), w2_ref[...],
                preferred_element_type=jnp.float32)
        + b2_ref[...]
    )
    o_ref[...] = y.astype(o_ref.dtype)


def decoder_forward(x, w1_t, b1, w2_t, b2, *, block_b=None, out_dtype=jnp.float32):
    """x: [B, in] f32 or bf16; w1_t: [in, hid_p] bf16; b1: [1, hid_p] f32;
    w2_t: [hid_p, out] bf16; b2: [1, out] f32.  Returns [B, out] `out_dtype`."""
    B, in_dim = x.shape
    hid = w1_t.shape[1]
    out_dim = w2_t.shape[1]

    v7x = _is_v7x()
    if block_b is None:
        # v7x: ~3.2 TB/s HBM makes the ~0.35us per-step overhead dominant at small
        # tiles -> use a larger default tile there. VMEM cost stays a few MiB
        # double-buffered, comfortably inside even v7x's 64 MiB.
        block_b = 4096 if v7x else 2048
    tb = _pick_batch_tile(B, block_b, min_steps=4 if v7x else 1)

    return pl.pallas_call(
        decoder_kernel,
        out_shape=jax.ShapeDtypeStruct((B, out_dim), out_dtype),
        grid=(pl.cdiv(B, tb),),
        in_specs=[
            pl.BlockSpec((tb, in_dim), lambda i: (i, 0)),     # streamed activations
            pl.BlockSpec((in_dim, hid), lambda i: (0, 0)),    # resident weights
            pl.BlockSpec((1, hid), lambda i: (0, 0)),
            pl.BlockSpec((hid, out_dim), lambda i: (0, 0)),
            pl.BlockSpec((1, out_dim), lambda i: (0, 0)),
        ],
        out_specs=pl.BlockSpec((tb, out_dim), lambda i: (i, 0)),
        compiler_params=pltpu.CompilerParams(
            dimension_semantics=("parallel",),  # shard batch tiles across TCs (v7x)
        ),
    )(x, w1_t, b1, w2_t, b2)


def init_decoder_params(key, shapes, dtype=jnp.float32):
    """PyTorch-layout params for Decoder(shapes):
    Linear(in=shapes[2] -> hid=shapes[1]), Tanh, Linear(hid -> out=shapes[0]).
    Mimics nn.Linear's default U(-1/sqrt(fan_in), 1/sqrt(fan_in)) init."""
    out_dim, hid_dim, in_dim = shapes
    k1, k2, k3, k4 = jax.random.split(key, 4)

    bound1 = in_dim ** -0.5
    w1 = jax.random.uniform(k1, (hid_dim, in_dim), dtype, -bound1, bound1)
    b1 = jax.random.uniform(k2, (hid_dim,), dtype, -bound1, bound1)

    bound2 = hid_dim ** -0.5
    w2 = jax.random.uniform(k3, (out_dim, hid_dim), dtype, -bound2, bound2)
    b2 = jax.random.uniform(k4, (out_dim,), dtype, -bound2, bound2)
    return w1, b1, w2, b2


def prepare_decoder_params(w1, b1, w2, b2, *, pad_hidden_to=128):
    """Kernel layout: transpose to [in, out], zero-pad the hidden dim to a
    lane-dense multiple (padded h columns are tanh(0)=0 and hit zero W2 rows,
    so the output is unchanged), weights in bf16, biases in f32 [1, N]."""
    hid, in_dim = w1.shape
    out_dim = w2.shape[0]
    hid_p = _round_up(hid, pad_hidden_to)

    w1_t = jnp.zeros((in_dim, hid_p), jnp.bfloat16).at[:, :hid].set(
        w1.T.astype(jnp.bfloat16))
    b1_p = jnp.zeros((1, hid_p), jnp.float32).at[:, :hid].set(
        b1.astype(jnp.float32))
    w2_t = jnp.zeros((hid_p, out_dim), jnp.bfloat16).at[:hid, :].set(
        w2.T.astype(jnp.bfloat16))
    b2_p = b2.reshape(1, out_dim).astype(jnp.float32)
    return w1_t, b1_p, w2_t, b2_p


def reference_forward(x, w1, b1, w2, b2):
    h = jnp.tanh(x @ w1.T + b1)
    return h @ w2.T + b2


if __name__ == "__main__":
    key = jax.random.PRNGKey(0)
    # shapes = (output, hidden, input) dims, exactly as Decoder(shapes) expects.
    shapes = (128, 64, 32)
    batch = 200  # not a multiple of the tile -> exercises masked boundary block

    kx, kp = jax.random.split(key)
    x = jax.random.normal(kx, (batch, shapes[2]), jnp.float32)
    w1, b1, w2, b2 = init_decoder_params(kp, shapes)
    w1_t, b1_p, w2_t, b2_p = prepare_decoder_params(w1, b1, w2, b2)
    ref = reference_forward(x, w1, b1, w2, b2)

    # Default (torch-semantics) path: f32 in / f32 out. block_b=128 -> grid of
    # 2 steps with a masked ragged last block (no wrapper pad / slice needed).
    out = decoder_forward(x, w1_t, b1_p, w2_t, b2_p, block_b=128)
    out = jax.block_until_ready(out)
    assert out.shape == (batch, shapes[0]), out.shape
    max_err = float(jnp.max(jnp.abs(out - ref)))
    # bf16 MXU operands vs. full-f32 reference -> tolerance widened accordingly.
    assert jnp.allclose(out, ref, atol=5e-2, rtol=5e-2), max_err

    # Bandwidth-optimized path: bf16 streamed activations + bf16 output
    # (in production the bf16 x would be produced fused into the upstream layer).
    out_bf16 = decoder_forward(x.astype(jnp.bfloat16), w1_t, b1_p, w2_t, b2_p,
                               block_b=128, out_dtype=jnp.bfloat16)
    out_bf16 = jax.block_until_ready(out_bf16)
    assert out_bf16.shape == (batch, shapes[0]), out_bf16.shape
    assert jnp.allclose(out_bf16.astype(jnp.float32), ref, atol=1e-1, rtol=1e-1)

    print("KERNEL_OK")
</pallas_src>

<mosaic_0001>
module attributes {stable_mosaic.version = 11 : i64} {
  func.func @decoder_kernel(%arg0: i32, %arg1: memref<128x32xf32, #tpu.memory_space<vmem>>, %arg2: memref<32x128xbf16, #tpu.memory_space<vmem>>, %arg3: memref<1x128xf32, #tpu.memory_space<vmem>>, %arg4: memref<128x128xbf16, #tpu.memory_space<vmem>>, %arg5: memref<1x128xf32, #tpu.memory_space<vmem>>, %arg6: memref<128x128xf32, #tpu.memory_space<vmem>>) attributes {dimension_semantics = [#tpu.dimension_semantics<parallel>], iteration_bounds = array<i64: 2>, scalar_prefetch = 0 : i64, scratch_operands = 0 : i64, tpu.core_type = #tpu.core_type<tc>, window_params = [{transform_indices = @transform_0, window_bounds = array<i64: 128, 32>}, {pipeline_mode = #tpu.pipeline_mode<synchronous>, transform_indices = @transform_1, window_bounds = array<i64: 32, 128>}, {pipeline_mode = #tpu.pipeline_mode<synchronous>, transform_indices = @transform_2, window_bounds = array<i64: 1, 128>}, {pipeline_mode = #tpu.pipeline_mode<synchronous>, transform_indices = @transform_3, window_bounds = array<i64: 128, 128>}, {pipeline_mode = #tpu.pipeline_mode<synchronous>, transform_indices = @transform_4, window_bounds = array<i64: 1, 128>}, {transform_indices = @transform_5, window_bounds = array<i64: 128, 128>}]} {
    %c0 = arith.constant 0 : index
    %c0_0 = arith.constant 0 : index
    %0 = vector.load %arg1[%c0, %c0_0] : memref<128x32xf32, #tpu.memory_space<vmem>>, vector<128x32xf32>
    %1 = arith.truncf %0 : vector<128x32xf32> to vector<128x32xbf16>
    %c0_1 = arith.constant 0 : index
    %c0_2 = arith.constant 0 : index
    %2 = vector.load %arg2[%c0_1, %c0_2] : memref<32x128xbf16, #tpu.memory_space<vmem>>, vector<32x128xbf16>
    %cst = arith.constant dense<0.000000e+00> : vector<128x128xf32>
    %3 = tpu.matmul %1, %2, %cst {dimension_numbers = #tpu.dot_dimension_numbers<[1], [0], [0], [1], [0, 0, 1, 1], [], []>} : vector<128x32xbf16>, vector<32x128xbf16>, vector<128x128xf32> -> vector<128x128xf32>
    %c0_3 = arith.constant 0 : index
    %c0_4 = arith.constant 0 : index
    %4 = vector.load %arg3[%c0_3, %c0_4] : memref<1x128xf32, #tpu.memory_space<vmem>>, vector<1x128xf32>
    %5 = vector.broadcast %4 : vector<1x128xf32> to vector<128x128xf32>
    %6 = arith.addf %3, %5 : vector<128x128xf32>
    %7 = math.tanh %6 : vector<128x128xf32>
    %8 = arith.truncf %7 : vector<128x128xf32> to vector<128x128xbf16>
    %c0_5 = arith.constant 0 : index
    %c0_6 = arith.constant 0 : index
    %9 = vector.load %arg4[%c0_5, %c0_6] : memref<128x128xbf16, #tpu.memory_space<vmem>>, vector<128x128xbf16>
    %cst_7 = arith.constant dense<0.000000e+00> : vector<128x128xf32>
    %10 = tpu.matmul %8, %9, %cst_7 {dimension_numbers = #tpu.dot_dimension_numbers<[1], [0], [0], [1], [0, 0, 1, 1], [], []>} : vector<128x128xbf16>, vector<128x128xbf16>, vector<128x128xf32> -> vector<128x128xf32>
    %c0_8 = arith.constant 0 : index
    %c0_9 = arith.constant 0 : index
    %11 = vector.load %arg5[%c0_8, %c0_9] : memref<1x128xf32, #tpu.memory_space<vmem>>, vector<1x128xf32>
    %12 = vector.broadcast %11 : vector<1x128xf32> to vector<128x128xf32>
    %13 = arith.addf %10, %12 : vector<128x128xf32>
    %c0_10 = arith.constant 0 : index
    %c0_11 = arith.constant 0 : index
    %14 = vector.load %arg6[%c0_10, %c0_11] : memref<128x128xf32, #tpu.memory_space<vmem>>, vector<128x128xf32>
    tpu.vector_store %arg6[%c0_10, %c0_11], %13 {strides = array<i32>} : memref<128x128xf32, #tpu.memory_space<vmem>>, vector<128x128xf32>,
    return
  }
  func.func @transform_0(%arg0: i32) -> (i32, i32) {
    %c0_i32 = arith.constant 0 : i32
    %c0_i32_0 = arith.constant 0 : i32
    return %arg0, %c0_i32 : i32, i32
  }
  func.func @transform_1(%arg0: i32) -> (i32, i32) {
    %c0_i32 = arith.constant 0 : i32
    %c0_i32_0 = arith.constant 0 : i32
    %c0_i32_1 = arith.constant 0 : i32
    return %c0_i32, %c0_i32_0 : i32, i32
  }
  func.func @transform_2(%arg0: i32) -> (i32, i32) {
    %c0_i32 = arith.constant 0 : i32
    %c0_i32_0 = arith.constant 0 : i32
    %c0_i32_1 = arith.constant 0 : i32
    return %c0_i32, %c0_i32_0 : i32, i32
  }
  func.func @transform_3(%arg0: i32) -> (i32, i32) {
    %c0_i32 = arith.constant 0 : i32
    %c0_i32_0 = arith.constant 0 : i32
    %c0_i32_1 = arith.constant 0 : i32
    return %c0_i32, %c0_i32_0 : i32, i32
  }
  func.func @transform_4(%arg0: i32) -> (i32, i32) {
    %c0_i32 = arith.constant 0 : i32
    %c0_i32_0 = arith.constant 0 : i32
    %c0_i32_1 = arith.constant 0 : i32
    return %c0_i32, %c0_i32_0 : i32, i32
  }
  func.func @transform_5(%arg0: i32) -> (i32, i32) {
    %c0_i32 = arith.constant 0 : i32
    %c0_i32_0 = arith.constant 0 : i32
    return %arg0, %c0_i32 : i32, i32
  }
}

</mosaic_0001>

<bundles_post_ra>
// kernel: tpu_custom_call.1
= control target key start
LH: loop header
LB: loop body
LE: loop exit
PB: predicated region body
PF: predicated region fallthrough
CT: control target
= control target key end

     0   :  { %10 = vsyncpa [#allocation3], 0  ;;  %s1222_s0 = inlined_call_operand.vmem [shape: f32[200,32], index: 0, kind: input, shape index: {}]   ;;  %s1223_s1 = inlined_call_operand.vmem [shape: bf16[32,128], index: 1, kind: input, shape index: {}]   ;;  %s1224_s2 = inlined_call_operand.vmem [shape: f32[1,128], index: 2, kind: input, shape index: {}]   ;;  %s1225_s3 = inlined_call_operand.vmem [shape: bf16[128,128], index: 3, kind: input, shape index: {}]   ;;  %s1226_s4 = inlined_call_operand.vmem [shape: f32[1,128], index: 4, kind: input, shape index: {}]   ;;  %s1227_s5 = inlined_call_operand.hbm [shape: f32[200,128], index: 5, kind: output, shape index: {}]  }
   0x1   :  { %12 = vsyncpa [#allocation3 + $0x1], 0  ;;  %s1020_s18 = smov 0   ;;  %s1022_s19 = smov 0  }
   0x2   :  { %s1024_s20 = smov 0   ;;  %s1026_s21 = smov 0  }
   0x3 LB: > { %s1041_s22 = sadd.s32 4294967295, %s985_s21   ;;  %s710_s23 = sadd.s32 4294967294, %s985_s21   ;;  %s985_s21 = sphi %s1026_s21, %s1233_s21   ;;  %s981_s20 = sphi %s1024_s20, %s1232_s20   ;;  %s977_s19 = sphi %s1022_s19, %s1231_s19   ;;  %s973_s18 = sphi %s1020_s18, %s1230_s18  }
   0x4   : > { %s1045_s24 = sadd.s32 1, %s985_s21   ;;  %s135_s25 = sadd.s32 1, %s981_s20 }
   0x5   : > { %s132_s26 = ssub.s32 %s985_s21, %s1045_s24  ;;  %p145_p0 = scmp.ne.s32.totalorder %s981_s20, %s977_s19 }
   0x6   : > { %p133_p1 = scmp.eq.s32.totalorder %s132_s26, 0  ;;  %p146_p2 = scmp.eq.s32.totalorder %s1041_s22, 1 }
   0x7   : > { %p151_p3 = scmp.ne.s32.totalorder %s977_s19, %s973_s18  ;;  %p152_p4 = scmp.eq.s32.totalorder %s710_s23, 1 }
   0x8   : > { %s1056_s27 = scalar_select %p133_p1, %s981_s20, %s135_s25  }
   0x9   : > { %p1058_p5 = por %p146_p2, %p145_p0  ;;  %p1062_p6 = por %p152_p4, %p151_p3 }
   0xa   : > { %p713_p7 = scmp.ge.s32.totalorder %s985_s21, 1  ;;  %p199_p8 = scmp.lt.s32.totalorder %s985_s21, 3 }
   0xc   : > { %p200_p9 = pnand %p713_p7, %p199_p8 }
   0xd   : > { %v881_v0 = vld [vmem:[%s1223_s1] sm:$0xff] (!%p200_p9)   ;;  %s1072_s7 = sshll.u32 (!%p200_p9), %s1041_s22, 4  ;;  %v882_v1 = vld [vmem:[%s1223_s1 + $0x8] sm:$0xff] (!%p200_p9)   ;;  %v885_v4 = vld [vmem:[%s1225_s3 + $0x10] sm:$0xff] (!%p200_p9)   ;;  %vm298_vm0 = vcmask (!%p200_p9), 261120  }
   0xe   : > { %203 = sbr.rel (%p200_p9) target bundleno = 530 (0x212), region = 40  ;;  %p236_p10 = scmp.lt.s32.totalorder (!%p200_p9), %s1072_s7, 24  ;;  %773 = vmatprep.subr.bf16.mxu0 (!%p200_p9), %v881_v0  ;;  %v883_v2 = vld [vmem:[%s1225_s3] sm:$0xff] (!%p200_p9)   ;;  %v884_v3 = vld [vmem:[%s1225_s3 + $0x8] sm:$0xff] (!%p200_p9)   ;;  %v886_v29 = vld [vmem:[%s1225_s3 + $0x18] sm:$0xff] (!%p200_p9)  }
   0xf   : > { %774 = vmatpush3.bf16.msra.mxu0 (!%p200_p9), %v881_v0  ;;  %825 = vmatprep.subr.bf16.mxu1 (!%p200_p9), %v883_v2  ;;  %v887_v30 = vld [vmem:[%s1225_s3 + $0x20] sm:$0xff] (!%p200_p9)   ;;  %v888_v31 = vld [vmem:[%s1225_s3 + $0x28] sm:$0xff] (!%p200_p9)   ;;  %v889_v32 = vld [vmem:[%s1225_s3 + $0x30] sm:$0xff] (!%p200_p9)  }
  0x10   : > { %775 = vmatprep.subr.bf16.mxu0 (!%p200_p9), %v882_v1  ;;  %833 = vmatpush3.bf16.msra.mxu1 (!%p200_p9), %v883_v2  ;;  %v890_v33 = vld [vmem:[%s1225_s3 + $0x38] sm:$0xff] (!%p200_p9)   ;;  %v717_v34 = vld [vmem:[%s1224_s2] ss:$0 sm:$0xff] (!%p200_p9) }
  0x11   : > { %826 = vmatprep.subr.bf16.mxu1 (!%p200_p9), %v884_v3 }
  0x13   : > { %776 = vmatpush3.bf16.msra.mxu0 (!%p200_p9), %v882_v1 }
  0x14   : > { %793 = vmatprep.subr.bf16.mxu0 (!%p200_p9), %v883_v2  ;;  %834 = vmatpush3.bf16.msra.mxu1 (!%p200_p9), %v884_v3 }
  0x15   : > { %s237_s12 = scalar_select %p236_p10, %s1072_s7, 24  ;;  %827 = vmatprep.subr.bf16.mxu1 %v885_v4 }
  0x16   : > { %s637_s9 = ssub.s32 (%p1058_p5), 25, %s1072_s7 }
  0x17   : > { %s716_s15 = sshll.u32 %s237_s12, 3  ;;  %p638_p11 = scmp.lt.s32.totalorder (%p1058_p5), %s637_s9, 16 }
  0x18   : > { %s1088_s23 = scalar_lea.vmem %s1222_s0, %s716_s15  ;;  %835 = vmatpush3.bf16.msra.mxu1 %v885_v4 }
  0x19   : > { %v251_v5 = vld [vmem:[%s1088_s23] sm:$0xff]  ;;  %v252_v6 = vld [vmem:[%s1088_s23 + $0x8] sm:$0xff]  ;;  %v253_v7 = vld [vmem:[%s1088_s23 + $0x10] sm:$0xff]  ;;  %828 = vmatprep.subr.bf16.mxu1 %v886_v29 }
  0x1a   : > { %v267_v8 = vpack.c.bf16 %v252_v6, %v251_v5  ;;  %v254_v9 = vld [vmem:[%s1088_s23 + $0x18] sm:$0xff]  ;;  %v255_v10 = vld [vmem:[%s1088_s23 + $0x20] sm:$0xff]  ;;  %v256_v11 = vld [vmem:[%s1088_s23 + $0x28] sm:$0xff] }
  0x1b   : > { %v268_v12 = vpack.c.bf16 %v254_v9, %v253_v7  ;;  %v269_v13 = vpack.c.bf16 %v256_v11, %v255_v10  ;;  %v257_v14 = vld [vmem:[%s1088_s23 + $0x30] sm:$0xff]  ;;  %v258_v15 = vld [vmem:[%s1088_s23 + $0x38] sm:$0xff]  ;;  %v259_v16 = vld [vmem:[%s1088_s23 + $0x40] sm:$0xff] }
  0x1c   : > { %777 = vmatprep.mubr.msk.bf16.mxu0 %vm298_vm0, %v267_v8  ;;  %v260_v17 = vld [vmem:[%s1088_s23 + $0x48] sm:$0xff]  ;;  %v270_v18 = vpack.c.bf16 %v258_v15, %v257_v14  ;;  %v261_v20 = vld [vmem:[%s1088_s23 + $0x50] sm:$0xff]  ;;  %v262_v21 = vld [vmem:[%s1088_s23 + $0x58] sm:$0xff]  ;;  %836 = vmatpush3.bf16.msra.mxu1 %v886_v29 }
  0x1d   : > { %778 = vmatmul.mubr.msk.bf16.vlgmr.msra.gmra.mrb[0].mxu0 %vm298_vm0, %v268_v12  ;;  %v271_v19 = vpack.c.bf16 %v260_v17, %v259_v16  ;;  %v263_v22 = vld [vmem:[%s1088_s23 + $0x60] sm:$0xff]  ;;  %v264_v23 = vld [vmem:[%s1088_s23 + $0x68] sm:$0xff]  ;;  %v272_v24 = vpack.c.bf16 %v262_v21, %v261_v20  ;;  %v265_v26 = vld [vmem:[%s1088_s23 + $0x70] sm:$0xff]  ;;  %829 = vmatprep.subr.bf16.mxu1 %v887_v30 }
  0x1e   : > { %781 = vmatprep.mubr.msk.bf16.mxu0 %vm298_vm0, %v269_v13  ;;  %794 = vmatpush3.bf16.msra.mxu0 %v883_v2  ;;  %v273_v25 = vpack.c.bf16 %v264_v23, %v263_v22  ;;  %v266_v27 = vld [vmem:[%s1088_s23 + $0x78] sm:$0xff]  ;;  %s228_s23 = sand.u32 1, %s977_s19  }
  0x1f   : > { %795 = vmatprep.subr.bf16.mxu0 %v884_v3  ;;  %v274_v28 = vpack.c.bf16 %v266_v27, %v265_v26  ;;  %s714_s25 = sshll.u32 %s228_s23, 7  ;;  %v728_v27 = vld [vmem:[%s1226_s4] ss:$0 sm:$0xff]  ;;  %s1161_s8 = scalar_lea.sflag [#allocation3], %s228_s23 }
  0x20   : > { %837 = vmatpush3.bf16.msra.mxu1 %v887_v30  ;;  %s1141_s6 = scalar_lea.vmem [#allocation2], %s714_s25 }
  0x21   : > { %830 = vmatprep.subr.bf16.mxu1 %v888_v31 }
  0x22   : > { %796 = vmatpush3.bf16.msra.mxu0 %v884_v3 }
  0x23   : > { %797 = vmatprep.subr.bf16.mxu0 %v885_v4 }
  0x24   : > { %838 = vmatpush3.bf16.msra.mxu1 %v888_v31 }
  0x25   : > { %782 = vmatmul.mubr.msk.bf16.gmra.mrb[4].mxu0 %vm298_vm0, %v270_v18  ;;  %831 = vmatprep.subr.bf16.mxu1 %v889_v32 }
  0x26   : > { %785 = vmatprep.mubr.msk.bf16.mxu0 %vm298_vm0, %v271_v19  ;;  %798 = vmatpush3.bf16.msra.mxu0 %v885_v4 }
  0x27   : > { %799 = vmatprep.subr.bf16.mxu0 %v886_v29 }
  0x28   : > { %839 = vmatpush3.bf16.msra.mxu1 %v889_v32 }
  0x29   : > { %832 = vmatprep.subr.bf16.mxu1 %v890_v33 }
  0x2a   : > { %800 = vmatpush3.bf16.msra.mxu0 %v886_v29 }
  0x2b   : > { %801 = vmatprep.subr.bf16.mxu0 %v887_v30 }
  0x2c   : > { %840 = vmatpush3.bf16.msra.mxu1 %v890_v33 }
  0x2d   : > { %786 = vmatmul.mubr.msk.bf16.gmra.mrb[8].mxu0 %vm298_vm0, %v272_v24 }
  0x2e   : > { %789 = vmatprep.mubr.msk.bf16.mxu0 %vm298_vm0, %v273_v25  ;;  %802 = vmatpush3.bf16.msra.mxu0 %v887_v30 }
  0x2f   : > { %803 = vmatprep.subr.bf16.mxu0 %v888_v31 }
  0x32   : > { %804 = vmatpush3.bf16.msra.mxu0 %v888_v31 }
  0x33   : > { %805 = vmatprep.subr.bf16.mxu0 %v889_v32 }
  0x35   : > { %790 = vmatmul.mubr.msk.bf16.gmra.mrb[12].mxu0 %vm298_vm0, %v274_v28 }
  0x36   : > { %806 = vmatpush3.bf16.msra.mxu0 %v889_v32 }
  0x37   : > { %807 = vmatprep.subr.bf16.mxu0 %v890_v33 }
  0x3a   : > { %808 = vmatpush3.bf16.msra.mxu0 %v890_v33 }
  0xf0   : > { %v779_v35 = vpop.f32.mrb[0].mxu0 }
  0xf1   : > { %v366_v36 = vadd.f32 %v779_v35, %v717_v34  ;;  %v357_v37 = vpop.f32.mrb[1].mxu0 }
  0xf2   : > { %v358_v38 = vadd.f32 %v717_v34, %v357_v37  ;;  %v780_v39 = vpop.f32.mrb[2].mxu0 }
  0xf3   : > { %891 = vtanh.f32 %v366_v36  ;;  %v369_v40 = vadd.f32 %v780_v39, %v717_v34  ;;  %v360_v41 = vpop.f32.mrb[3].mxu0 }
  0xf4   : > { %893 = vtanh.f32 %v358_v38  ;;  %v361_v42 = vadd.f32 %v717_v34, %v360_v41 }
  0xf5   : > { %895 = vtanh.f32 %v369_v40 }
  0xf6   : > { %897 = vtanh.f32 %v361_v42 }
  0xf8   : > { %v783_v43 = vpop.f32.mrb[4].mxu0 }
  0xf9   : > { %v382_v44 = vadd.f32 %v783_v43, %v717_v34  ;;  %v373_v45 = vpop.f32.mrb[5].mxu0 }
  0xfa   : > { %v374_v46 = vadd.f32 %v717_v34, %v373_v45  ;;  %v784_v47 = vpop.f32.mrb[6].mxu0 }
  0xfb   : > { %899 = vtanh.f32 %v382_v44  ;;  %v385_v48 = vadd.f32 %v784_v47, %v717_v34  ;;  %v376_v49 = vpop.f32.mrb[7].mxu0 }
  0xfc   : > { %901 = vtanh.f32 %v374_v46  ;;  %v377_v50 = vadd.f32 %v717_v34, %v376_v49 }
  0xfd   : > { %v892_v51 = vpop.eup %891  ;;  %903 = vtanh.f32 %v385_v48 }
  0xfe   : > { %v894_v52 = vpop.eup %893  ;;  %905 = vtanh.f32 %v377_v50 }
  0xff   : > { %v896_v53 = vpop.eup %895 }
 0x100   : > { %v898_v54 = vpop.eup %897  ;;  %v787_v55 = vpop.f32.mrb[8].mxu0  ;;  %v437_v56 = vpack.c.bf16 %v896_v53, %v892_v51 }
 0x101   : > { %v398_v57 = vadd.f32 %v787_v55, %v717_v34  ;;  %v389_v58 = vpop.f32.mrb[9].mxu0  ;;  %v436_v59 = vpack.c.bf16 %v898_v54, %v894_v52 }
 0x102   : > { %v390_v60 = vadd.f32 %v717_v34, %v389_v58  ;;  %v788_v61 = vpop.f32.mrb[10].mxu0 }
 0x103   : > { %907 = vtanh.f32 %v398_v57  ;;  %v401_v62 = vadd.f32 %v788_v61, %v717_v34  ;;  %v392_v63 = vpop.f32.mrb[11].mxu0  ;;  %809 = vmatprep.mubr.bf16.mxu0 %v436_v59 }
 0x104   : > { %909 = vtanh.f32 %v390_v60  ;;  %v393_v0 = vadd.f32 %v717_v34, %v392_v63  ;;  %810 = vmatmul.mubr.bf16.vlgmr.msra.gmra.mrb[16].mxu0 %v437_v56 }
 0x105   : > { %v900_v1 = vpop.eup %899  ;;  %911 = vtanh.f32 %v401_v62 }
 0x106   : > { %v902_v2 = vpop.eup %901  ;;  %913 = vtanh.f32 %v393_v0 }
 0x107   : > { %v904_v3 = vpop.eup %903 }
 0x108   : > { %v906_v4 = vpop.eup %905  ;;  %v791_v5 = vpop.f32.mrb[12].mxu0  ;;  %v439_v6 = vpack.c.bf16 %v904_v3, %v900_v1 }
 0x109   : > { %v414_v7 = vadd.f32 %v791_v5, %v717_v34  ;;  %v405_v8 = vpop.f32.mrb[13].mxu0  ;;  %v438_v9 = vpack.c.bf16 %v906_v4, %v902_v2 }
 0x10a   : > { %v406_v10 = vadd.f32 %v717_v34, %v405_v8  ;;  %v792_v11 = vpop.f32.mrb[14].mxu0 }
 0x10b   : > { %915 = vtanh.f32 %v414_v7  ;;  %v417_v12 = vadd.f32 %v792_v11, %v717_v34  ;;  %v408_v13 = vpop.f32.mrb[15].mxu0  ;;  %813 = vmatprep.mubr.bf16.mxu1 %v438_v9 }
 0x10c   : > { %917 = vtanh.f32 %v406_v10  ;;  %v409_v14 = vadd.f32 %v717_v34, %v408_v13  ;;  %814 = vmatmul.mubr.bf16.vlgmr.msra.gmra.mrb[0].mxu1 %v439_v6 }
 0x10d   : > { %v908_v15 = vpop.eup %907  ;;  %919 = vtanh.f32 %v417_v12 }
 0x10e   : > { %v910_v16 = vpop.eup %909  ;;  %921 = vtanh.f32 %v409_v14 }
 0x10f   : > { %v912_v17 = vpop.eup %911 }
 0x110   : > { %v914_v18 = vpop.eup %913  ;;  %v441_v19 = vpack.c.bf16 %v912_v17, %v908_v15 }
 0x111   : > { %v440_v20 = vpack.c.bf16 %v914_v18, %v910_v16 }
 0x113   : > { %817 = vmatprep.mubr.bf16.mxu1 %v440_v20 }
 0x114   : > { %818 = vmatmul.mubr.bf16.gmra.mrb[4].mxu1 %v441_v19 }
 0x115   : > { %v916_v21 = vpop.eup %915 }
 0x116   : > { %v918_v22 = vpop.eup %917 }
 0x117   : > { %v920_v23 = vpop.eup %919 }
 0x118   : > { %v922_v24 = vpop.eup %921  ;;  %v443_v25 = vpack.c.bf16 %v920_v23, %v916_v21 }
 0x119   : > { %v442_v26 = vpack.c.bf16 %v922_v24, %v918_v22 }
 0x11b   : > { %821 = vmatprep.mubr.bf16.mxu1 %v442_v26 }
 0x11c   : > { %822 = vmatmul.mubr.bf16.gmra.mrb[8].mxu1 %v443_v25 }
 0x1d7   : > { %v811_v28 = vpop.f32.mrb[16].mxu0 }
 0x1d8   : > { %v558_v29 = vadd.f32 %v811_v28, %v728_v27  ;;  %v549_v30 = vpop.f32.mrb[17].mxu0 }
 0x1d9   : > { %v550_v31 = vadd.f32 %v728_v27, %v549_v30  ;;  %v812_v32 = vpop.f32.mrb[18].mxu0 }
 0x1da   : > { %614 = vst [vmem:[%s1141_s6 + $0x10] sm:$0xff] %v558_v29  ;;  %v561_v33 = vadd.f32 %v812_v32, %v728_v27  ;;  %v552_v34 = vpop.f32.mrb[19].mxu0 }
 0x1db   : > { %612 = vst [vmem:[%s1141_s6] sm:$0xff] %v550_v31  ;;  %v553_v35 = vadd.f32 %v728_v27, %v552_v34 }
 0x1dc   : > { %615 = vst [vmem:[%s1141_s6 + $0x18] sm:$0xff] %v561_v33 }
 0x1dd   : > { %613 = vst [vmem:[%s1141_s6 + $0x8] sm:$0xff] %v553_v35 }
 0x1df   : > { %v815_v36 = vpop.f32.mrb[0].mxu1 }
 0x1e0   : > { %v574_v37 = vadd.f32 %v815_v36, %v728_v27  ;;  %v565_v38 = vpop.f32.mrb[1].mxu1 }
 0x1e1   : > { %v566_v39 = vadd.f32 %v728_v27, %v565_v38  ;;  %v816_v40 = vpop.f32.mrb[2].mxu1 }
 0x1e2   : > { %618 = vst [vmem:[%s1141_s6 + $0x30] sm:$0xff] %v574_v37  ;;  %v577_v41 = vadd.f32 %v816_v40, %v728_v27  ;;  %v568_v42 = vpop.f32.mrb[3].mxu1 }
 0x1e3   : > { %616 = vst [vmem:[%s1141_s6 + $0x20] sm:$0xff] %v566_v39  ;;  %v569_v43 = vadd.f32 %v728_v27, %v568_v42 }
 0x1e4   : > { %619 = vst [vmem:[%s1141_s6 + $0x38] sm:$0xff] %v577_v41 }
 0x1e5   : > { %617 = vst [vmem:[%s1141_s6 + $0x28] sm:$0xff] %v569_v43 }
 0x1e7   : > { %v819_v44 = vpop.f32.mrb[4].mxu1 }
 0x1e8   : > { %v590_v45 = vadd.f32 %v819_v44, %v728_v27  ;;  %v581_v46 = vpop.f32.mrb[5].mxu1 }
 0x1e9   : > { %v582_v47 = vadd.f32 %v728_v27, %v581_v46  ;;  %v820_v48 = vpop.f32.mrb[6].mxu1 }
 0x1ea   : > { %622 = vst [vmem:[%s1141_s6 + $0x50] sm:$0xff] %v590_v45  ;;  %v593_v49 = vadd.f32 %v820_v48, %v728_v27  ;;  %v584_v50 = vpop.f32.mrb[7].mxu1 }
 0x1eb   : > { %620 = vst [vmem:[%s1141_s6 + $0x40] sm:$0xff] %v582_v47  ;;  %v585_v51 = vadd.f32 %v728_v27, %v584_v50 }
 0x1ec   : > { %623 = vst [vmem:[%s1141_s6 + $0x58] sm:$0xff] %v593_v49 }
 0x1ed   : > { %621 = vst [vmem:[%s1141_s6 + $0x48] sm:$0xff] %v585_v51 }
 0x1ef   : > { %v823_v52 = vpop.f32.mrb[8].mxu1  ;;  %635 = sbr.rel (!%p1058_p5) target bundleno = 530 (0x212), region = 44 }
 0x1f0   : > { %v606_v53 = vadd.f32 %v823_v52, %v728_v27  ;;  %v597_v54 = vpop.f32.mrb[9].mxu1 }
 0x1f1   : > { %v598_v55 = vadd.f32 %v728_v27, %v597_v54  ;;  %v824_v56 = vpop.f32.mrb[10].mxu1 }
 0x1f2   : > { %626 = vst [vmem:[%s1141_s6 + $0x70] sm:$0xff] %v606_v53  ;;  %v609_v57 = vadd.f32 %v824_v56, %v728_v27  ;;  %v600_v58 = vpop.f32.mrb[11].mxu1 }
 0x1f3   : > { %624 = vst [vmem:[%s1141_s6 + $0x60] sm:$0xff] %v598_v55  ;;  %v601_v59 = vadd.f32 %v728_v27, %v600_v58 }
 0x1f4   : > { %627 = vst [vmem:[%s1141_s6 + $0x78] sm:$0xff] %v609_v57 }
 0x1f5   : > { %625 = vst [vmem:[%s1141_s6 + $0x68] sm:$0xff] %v601_v59 }
 0x1f6   : > { %s1235_s9 = smov (!%p638_p11, %s637_s9), 16 }
 0x1f7   : > { %s1166_s10 = sshll.u32 %s1235_s9, 7 }
 0x1f8   : > { %s642_s11 = ssub.s32 2048, %s1166_s10 }
 0x1f9   : > { %643 = vsyncadd %s1161_s8, %s642_s11  ;;  %p740_p12 = scmp.ne.s32.totalorder %s1166_s10, 0  ;;  %s746_s12 = sshll.u32 %s1041_s22, 11 }
 0x1fa   : > { %s1175_s14 = scalar_lea.hbm %s1227_s5, %s746_s12  ;;  %s648_s7 = sshll.u32 %s1141_s6, 4  ;;  %s1178_s7 = int_to_ptr.vmem [resolvable:$true] %s648_s7 }
 0x1fb   : > { %s923_s15 = scalar_lea.vmem %s1178_s7, %s1166_s10  ;;  %s987_s16 = smov [#allocation2]  }
 0x1fc   : > { %p924_p13 = scmp.ne.s32.totalorder %s1178_s7, %s923_s15  ;;  %s927_s17 = sshll.u32 %s987_s16, 4  ;;  %s928_s17 = int_to_ptr.vmem [resolvable:$false] %s927_s17 }
 0x1fd   : > { %s929_s22 = scalar_lea.vmem %s928_s17, 4096  ;;  %p930_p2 = scmp.lt.s32.totalorder %s1178_s7, %s928_s17 }
 0x1fe   : > { %p925_p0 = pnand %p924_p13, %p740_p12  ;;  %p931_p3 = scmp.lt.s32.totalorder %s929_s22, %s923_s15 }
 0x200   : > { %p926_p1 = pneg %p925_p0  ;;  %p932_p4 = por %p931_p3, %p930_p2 }
 0x202   : > { %p933_p5 = pnand %p932_p4, %p926_p1 }
 0x204   : > { %936 = shalt.err (!%p933_p5)
}
 0x205   : > { %s937_s23 = scalar_lea.hbm %s1175_s14, %s1166_s10  ;;  %s941_s30 = scalar_lea.hbm %s1227_s5, 3200 }
 0x206   : > { %p938_p7 = scmp.ne.s32.totalorder %s1175_s14, %s937_s23  ;;  %p942_p10 = scmp.lt.u32.totalorder %s1175_s14, %s1227_s5 }
 0x207   : > { %p943_p11 = scmp.lt.u32.totalorder %s941_s30, %s937_s23  ;;  %p945_p0 = scmp.lt.u32.totalorder %s937_s23, %s1175_s14 }
 0x208   : > { %p939_p8 = pnand %p938_p7, %p740_p12 }
 0x209   : > { %p944_p13 = por %p943_p11, %p942_p10 }
 0x20a   : > { %p940_p9 = pneg %p939_p8 }
 0x20b   : > { %p946_p1 = por %p945_p0, %p944_p13 }
 0x20d   : > { %p947_p2 = pnand %p946_p1, %p940_p9 }
 0x20f   : > { %950 = shalt.err (!%p947_p2)
}
 0x210   : > { %s988_s11 = smov 128   ;;  %s989_s12 = smov 8  }
 0x211   : > { %654 = dma.vmem_to_hbm [thread:$0]  (%p740_p12), %s1178_s7, %s1166_s10, %s1175_s14, %s1161_s8, %s988_s11, %s988_s11, %s989_s12  }
 0x212 PF: > { %p846_p3 = scmp.ge.s32.totalorder %s985_s21, 2  ;;  %s663_s13 = sand.u32 1, %s973_s18  }
 0x213   : > { %s664_s28 = scalar_lea.sflag [#allocation3], %s663_s13 }
 0x214   : > { %p843_p4 = pnand %p846_p3, %p1062_p6 }
 0x216   : > { %968 = dma.done.wait (!%p843_p4), %s664_s28, 2048  }
 0x217   : > { %970 = vsyncadd (!%p843_p4), %s664_s28, 4294965248  ;;  %p15_p5 = scmp.ge.s32.totalorder %s1045_s24, 4   ;;  %s1230_s18 = smov %s977_s19 }
 0x218   : > { %s1231_s19 = smov %s981_s20  ;;  %s1232_s20 = smov %s1056_s27 }
 0x219   : > { %s1233_s21 = smov %s1045_s24  ;;  %17 = sbr.rel (!%p15_p5) target bundleno = 3 (0x3), region = 75 }
 0x220   :  { %669 = vsyncpa [#allocation3], 1 }
 0x221   :  { %671 = vsyncpa [#allocation3 + $0x1], 1 }

</bundles_post_ra>
